<compile_context>
chip_gen: v7x
topology: tpu7x:2x2x1
jax: 0.10.0
libtpu: 0.0.40
codegen_flags: <defaults>
</compile_context>

<pallas_src>
import jax
import jax.numpy as jnp
from jax.experimental import pallas as pl
from jax.experimental.pallas import tpu as pltpu

HIDDEN_LOGICAL = 10     # n = 10 in the PyTorch module
HIDDEN_PADDED = 128     # padded to one full lane tile (zero weights/biases)
MAX_BATCH_TILE = 2048   # rows per grid step (multiple of 8; fits VMEM easily
                        # even under v7x's 32 MiB default scoped limit)


def _mlp_kernel(x_ref, w1_ref, b1_ref, w2_ref, b2_ref, w3_ref, b3_ref, o_ref):
    # x: (TB, in_dim) bf16; weights bf16; biases f32. MXU matmuls accumulate
    # in f32; bias add / ReLU stay in f32 (v5e VPU has no bf16).
    x = x_ref[...]

    # Layer 1: Linear(in_dim, 128-padded) + ReLU
    h1 = jnp.dot(x, w1_ref[...], preferred_element_type=jnp.float32)
    h1 = jnp.maximum(h1 + b1_ref[...], 0.0)

    # Layer 2: Linear(128, 128) + ReLU   (padded lanes stay exactly zero)
    h2 = jnp.dot(h1.astype(w2_ref.dtype), w2_ref[...],
                 preferred_element_type=jnp.float32)
    h2 = jnp.maximum(h2 + b2_ref[...], 0.0)

    # Layer 3: Linear(128, out_dim) -> logits (no activation)
    logits = jnp.dot(h2.astype(w3_ref.dtype), w3_ref[...],
                     preferred_element_type=jnp.float32) + b3_ref[...]

    o_ref[...] = logits.astype(o_ref.dtype)


def _batch_tile(batch):
    """Pick the batch block size. A block equal to the full batch is always
    legal; otherwise the block must be a multiple of 8 sublanes."""
    if batch <= MAX_BATCH_TILE:
        return batch
    return MAX_BATCH_TILE


def policy_network_forward(state, params):
    """Fused forward pass of PolicyNetwork.

    state:  (batch, in_dim) float32 (or bfloat16)
    params: dict with padded bf16 weights w1 (in_dim,128), w2 (128,128),
            w3 (128,out_dim) and f32 biases b1/b2 (1,128), b3 (1,out_dim).
    returns logits: (batch, out_dim) float32
    """
    batch, in_dim = state.shape
    out_dim = params["w3"].shape[1]

    tb = _batch_tile(batch)
    nb = pl.cdiv(batch, tb)

    # In production the caller should keep `state` in bf16 in HBM; this cast
    # is only a convenience for f32 inputs.
    x = state.astype(jnp.bfloat16)
    w1, w2, w3 = params["w1"], params["w2"], params["w3"]
    b1, b2, b3 = params["b1"], params["b2"], params["b3"]

    const2d = lambda shape: pl.BlockSpec(shape, lambda i: (0, 0))

    return pl.pallas_call(
        _mlp_kernel,
        out_shape=jax.ShapeDtypeStruct((batch, out_dim), jnp.float32),
        grid_spec=pltpu.PrefetchScalarGridSpec(
            num_scalar_prefetch=0,
            grid=(nb,),
            in_specs=[
                pl.BlockSpec((tb, in_dim), lambda i: (i, 0)),   # state: batch-tiled
                const2d(w1.shape),
                const2d(b1.shape),
                const2d(w2.shape),
                const2d(b2.shape),
                const2d(w3.shape),
                const2d(b3.shape),
            ],
            out_specs=pl.BlockSpec((tb, out_dim), lambda i: (i, 0)),
        ),
        compiler_params=pltpu.CompilerParams(
            # Batch blocks are independent -> shard across v7x's 2 TensorCores.
            dimension_semantics=("parallel",),
        ),
    )(x, w1, b1, w2, b2, w3, b3)


def init_params(key, in_dim, out_dim):
    """PyTorch nn.Linear default init (U(-1/sqrt(fan_in), 1/sqrt(fan_in))) on
    the logical 10-unit hidden layers, then zero-pad the hidden dim to 128 and
    cast weights to bf16 once, at init time (not in the kernel)."""
    def linear(k, fan_in, fan_out):
        kw, kb = jax.random.split(k)
        bound = 1.0 / jnp.sqrt(jnp.float32(fan_in))
        w = jax.random.uniform(kw, (fan_in, fan_out), jnp.float32, -bound, bound)
        b = jax.random.uniform(kb, (1, fan_out), jnp.float32, -bound, bound)
        return w, b

    k1, k2, k3 = jax.random.split(key, 3)
    w1, b1 = linear(k1, in_dim, HIDDEN_LOGICAL)
    w2, b2 = linear(k2, HIDDEN_LOGICAL, HIDDEN_LOGICAL)
    w3, b3 = linear(k3, HIDDEN_LOGICAL, out_dim)

    pad = HIDDEN_PADDED - HIDDEN_LOGICAL
    return {
        "w1": jnp.pad(w1, ((0, 0), (0, pad))).astype(jnp.bfloat16),
        "b1": jnp.pad(b1, ((0, 0), (0, pad))),
        "w2": jnp.pad(w2, ((0, pad), (0, pad))).astype(jnp.bfloat16),
        "b2": jnp.pad(b2, ((0, 0), (0, pad))),
        "w3": jnp.pad(w3, ((0, pad), (0, 0))).astype(jnp.bfloat16),
        "b3": b3,
    }


def reference_forward(state, params):
    """Pure-JAX reference with the same bf16-matmul / f32-accumulate recipe."""
    x = state.astype(jnp.bfloat16)
    h1 = jnp.dot(x, params["w1"], preferred_element_type=jnp.float32) + params["b1"]
    h1 = jnp.maximum(h1, 0.0)
    h2 = jnp.dot(h1.astype(jnp.bfloat16), params["w2"],
                 preferred_element_type=jnp.float32) + params["b2"]
    h2 = jnp.maximum(h2, 0.0)
    return jnp.dot(h2.astype(jnp.bfloat16), params["w3"],
                   preferred_element_type=jnp.float32) + params["b3"]


if __name__ == "__main__":
    key = jax.random.PRNGKey(0)
    k_param, k_small, k_big = jax.random.split(key, 3)

    in_dim, out_dim = 32, 4
    params = init_params(k_param, in_dim, out_dim)

    fwd = jax.jit(policy_network_forward)

    # Small batch, matching the module's typical per-step usage (single block).
    state_small = jax.random.normal(k_small, (2, in_dim), jnp.float32)
    logits_small = fwd(state_small, params)
    jax.block_until_ready(logits_small)
    assert logits_small.shape == (2, out_dim)
    assert jnp.allclose(logits_small, reference_forward(state_small, params),
                        atol=1e-3, rtol=1e-3)

    # Larger batch exercising the tiled, double-buffered, megacore grid path.
    state_big = jax.random.normal(k_big, (2 * MAX_BATCH_TILE, in_dim), jnp.float32)
    logits_big = fwd(state_big, params)
    jax.block_until_ready(logits_big)
    assert logits_big.shape == (2 * MAX_BATCH_TILE, out_dim)
    assert jnp.allclose(logits_big, reference_forward(state_big, params),
                        atol=1e-3, rtol=1e-3)

    # TODO(synk): get_action's Categorical sampling / log_prob bookkeeping and
    # NaN-to-CSV error logging are host-side control flow, not kernel compute.

    print("KERNEL_OK")
</pallas_src>

<mosaic_0001>
module attributes {stable_mosaic.version = 11 : i64} {
  func.func @_mlp_kernel(%arg0: i32, %arg1: memref<2x32xbf16, #tpu.memory_space<vmem>>, %arg2: memref<32x128xbf16, #tpu.memory_space<vmem>>, %arg3: memref<1x128xf32, #tpu.memory_space<vmem>>, %arg4: memref<128x128xbf16, #tpu.memory_space<vmem>>, %arg5: memref<1x128xf32, #tpu.memory_space<vmem>>, %arg6: memref<128x4xbf16, #tpu.memory_space<vmem>>, %arg7: memref<1x4xf32, #tpu.memory_space<vmem>>, %arg8: memref<2x4xf32, #tpu.memory_space<vmem>>) attributes {dimension_semantics = [#tpu.dimension_semantics<parallel>], iteration_bounds = array<i64: 1>, scalar_prefetch = 0 : i64, scratch_operands = 0 : i64, tpu.core_type = #tpu.core_type<tc>, window_params = [{transform_indices = @transform_0, window_bounds = array<i64: 2, 32>}, {pipeline_mode = #tpu.pipeline_mode<synchronous>, transform_indices = @transform_1, window_bounds = array<i64: 32, 128>}, {pipeline_mode = #tpu.pipeline_mode<synchronous>, transform_indices = @transform_2, window_bounds = array<i64: 1, 128>}, {pipeline_mode = #tpu.pipeline_mode<synchronous>, transform_indices = @transform_3, window_bounds = array<i64: 128, 128>}, {pipeline_mode = #tpu.pipeline_mode<synchronous>, transform_indices = @transform_4, window_bounds = array<i64: 1, 128>}, {pipeline_mode = #tpu.pipeline_mode<synchronous>, transform_indices = @transform_5, window_bounds = array<i64: 128, 4>}, {pipeline_mode = #tpu.pipeline_mode<synchronous>, transform_indices = @transform_6, window_bounds = array<i64: 1, 4>}, {transform_indices = @transform_7, window_bounds = array<i64: 2, 4>}]} {
    %c0 = arith.constant 0 : index
    %c0_0 = arith.constant 0 : index
    %0 = vector.load %arg1[%c0, %c0_0] : memref<2x32xbf16, #tpu.memory_space<vmem>>, vector<2x32xbf16>
    %c0_1 = arith.constant 0 : index
    %c0_2 = arith.constant 0 : index
    %1 = vector.load %arg2[%c0_1, %c0_2] : memref<32x128xbf16, #tpu.memory_space<vmem>>, vector<32x128xbf16>
    %cst = arith.constant dense<0.000000e+00> : vector<2x128xf32>
    %2 = tpu.matmul %0, %1, %cst {dimension_numbers = #tpu.dot_dimension_numbers<[1], [0], [0], [1], [0, 0, 1, 1], [], []>} : vector<2x32xbf16>, vector<32x128xbf16>, vector<2x128xf32> -> vector<2x128xf32>
    %c0_3 = arith.constant 0 : index
    %c0_4 = arith.constant 0 : index
    %3 = vector.load %arg3[%c0_3, %c0_4] : memref<1x128xf32, #tpu.memory_space<vmem>>, vector<1x128xf32>
    %4 = vector.broadcast %3 : vector<1x128xf32> to vector<2x128xf32>
    %5 = arith.addf %2, %4 : vector<2x128xf32>
    %cst_5 = arith.constant 0.000000e+00 : f32
    %6 = vector.broadcast %cst_5 : f32 to vector<2x128xf32>
    %7 = arith.maximumf %5, %6 : vector<2x128xf32>
    %8 = arith.truncf %7 : vector<2x128xf32> to vector<2x128xbf16>
    %c0_6 = arith.constant 0 : index
    %c0_7 = arith.constant 0 : index
    %9 = vector.load %arg4[%c0_6, %c0_7] : memref<128x128xbf16, #tpu.memory_space<vmem>>, vector<128x128xbf16>
    %cst_8 = arith.constant dense<0.000000e+00> : vector<2x128xf32>
    %10 = tpu.matmul %8, %9, %cst_8 {dimension_numbers = #tpu.dot_dimension_numbers<[1], [0], [0], [1], [0, 0, 1, 1], [], []>} : vector<2x128xbf16>, vector<128x128xbf16>, vector<2x128xf32> -> vector<2x128xf32>
    %c0_9 = arith.constant 0 : index
    %c0_10 = arith.constant 0 : index
    %11 = vector.load %arg5[%c0_9, %c0_10] : memref<1x128xf32, #tpu.memory_space<vmem>>, vector<1x128xf32>
    %12 = vector.broadcast %11 : vector<1x128xf32> to vector<2x128xf32>
    %13 = arith.addf %10, %12 : vector<2x128xf32>
    %cst_11 = arith.constant 0.000000e+00 : f32
    %14 = vector.broadcast %cst_11 : f32 to vector<2x128xf32>
    %15 = arith.maximumf %13, %14 : vector<2x128xf32>
    %16 = arith.truncf %15 : vector<2x128xf32> to vector<2x128xbf16>
    %c0_12 = arith.constant 0 : index
    %c0_13 = arith.constant 0 : index
    %17 = vector.load %arg6[%c0_12, %c0_13] : memref<128x4xbf16, #tpu.memory_space<vmem>>, vector<128x4xbf16>
    %cst_14 = arith.constant dense<0.000000e+00> : vector<2x4xf32>
    %18 = tpu.matmul %16, %17, %cst_14 {dimension_numbers = #tpu.dot_dimension_numbers<[1], [0], [0], [1], [0, 0, 1, 1], [], []>} : vector<2x128xbf16>, vector<128x4xbf16>, vector<2x4xf32> -> vector<2x4xf32>
    %c0_15 = arith.constant 0 : index
    %c0_16 = arith.constant 0 : index
    %19 = vector.load %arg7[%c0_15, %c0_16] : memref<1x4xf32, #tpu.memory_space<vmem>>, vector<1x4xf32>
    %20 = vector.broadcast %19 : vector<1x4xf32> to vector<2x4xf32>
    %21 = arith.addf %18, %20 : vector<2x4xf32>
    %c0_17 = arith.constant 0 : index
    %c0_18 = arith.constant 0 : index
    %22 = vector.load %arg8[%c0_17, %c0_18] : memref<2x4xf32, #tpu.memory_space<vmem>>, vector<2x4xf32>
    tpu.vector_store %arg8[%c0_17, %c0_18], %21 {strides = array<i32>} : memref<2x4xf32, #tpu.memory_space<vmem>>, vector<2x4xf32>,
    return
  }
  func.func @transform_0(%arg0: i32) -> (i32, i32) {
    %c0_i32 = arith.constant 0 : i32
    %c0_i32_0 = arith.constant 0 : i32
    return %arg0, %c0_i32 : i32, i32
  }
  func.func @transform_1(%arg0: i32) -> (i32, i32) {
    %c0_i32 = arith.constant 0 : i32
    %c0_i32_0 = arith.constant 0 : i32
    %c0_i32_1 = arith.constant 0 : i32
    return %c0_i32, %c0_i32_0 : i32, i32
  }
  func.func @transform_2(%arg0: i32) -> (i32, i32) {
    %c0_i32 = arith.constant 0 : i32
    %c0_i32_0 = arith.constant 0 : i32
    %c0_i32_1 = arith.constant 0 : i32
    return %c0_i32, %c0_i32_0 : i32, i32
  }
  func.func @transform_3(%arg0: i32) -> (i32, i32) {
    %c0_i32 = arith.constant 0 : i32
    %c0_i32_0 = arith.constant 0 : i32
    %c0_i32_1 = arith.constant 0 : i32
    return %c0_i32, %c0_i32_0 : i32, i32
  }
  func.func @transform_4(%arg0: i32) -> (i32, i32) {
    %c0_i32 = arith.constant 0 : i32
    %c0_i32_0 = arith.constant 0 : i32
    %c0_i32_1 = arith.constant 0 : i32
    return %c0_i32, %c0_i32_0 : i32, i32
  }
  func.func @transform_5(%arg0: i32) -> (i32, i32) {
    %c0_i32 = arith.constant 0 : i32
    %c0_i32_0 = arith.constant 0 : i32
    %c0_i32_1 = arith.constant 0 : i32
    return %c0_i32, %c0_i32_0 : i32, i32
  }
  func.func @transform_6(%arg0: i32) -> (i32, i32) {
    %c0_i32 = arith.constant 0 : i32
    %c0_i32_0 = arith.constant 0 : i32
    %c0_i32_1 = arith.constant 0 : i32
    return %c0_i32, %c0_i32_0 : i32, i32
  }
  func.func @transform_7(%arg0: i32) -> (i32, i32) {
    %c0_i32 = arith.constant 0 : i32
    %c0_i32_0 = arith.constant 0 : i32
    return %arg0, %c0_i32 : i32, i32
  }
}

</mosaic_0001>

<bundles_post_ra>
// kernel: policy_network_forward.1
= control target key start
LH: loop header
LB: loop body
LE: loop exit
PB: predicated region body
PF: predicated region fallthrough
CT: control target
= control target key end

     0   :  { %v474_v1 = vmov 0.0   ;;  %vm475_vm0 = vmmov 0   ;;  %vm52_vm1 = vcmask 261120   ;;  %s619_s0 = inlined_call_operand.vmem [shape: bf16[2,32], index: 0, kind: input, shape index: {}]   ;;  %s620_s1 = inlined_call_operand.vmem [shape: bf16[32,128], index: 1, kind: input, shape index: {}]   ;;  %s621_s2 = inlined_call_operand.vmem [shape: f32[1,128], index: 2, kind: input, shape index: {}]   ;;  %s622_s3 = inlined_call_operand.vmem [shape: bf16[128,128], index: 3, kind: input, shape index: {}]   ;;  %s623_s4 = inlined_call_operand.vmem [shape: f32[1,128], index: 4, kind: input, shape index: {}]   ;;  %s624_s5 = inlined_call_operand.vmem [shape: bf16[128,4], index: 5, kind: input, shape index: {}]   ;;  %s625_s6 = inlined_call_operand.vmem [shape: f32[1,4], index: 6, kind: input, shape index: {}]   ;;  %s626_s7 = inlined_call_operand.hbm [shape: f32[2,4], index: 7, kind: output, shape index: {}]  }
   0x1   :  { %v432_v0 = vld [vmem:[%s620_s1] sm:$0xff]   ;;  %381 = vmatprep.subr.bf16.mxu0 %v474_v1  ;;  %389 = vmatprep.subr.bf16.mxu1 %v474_v1  ;;  %v433_v2 = vld [vmem:[%s620_s1 + $0x8] sm:$0xff]   ;;  %v436_v6 = vld [vmem:[%s622_s3 + $0x10] sm:$0xff]  }
   0x2   :  { %382 = vmatpush3.bf16.msra.mxu0 %v432_v0  ;;  %385 = vmatprep.mubr.msk.bf16.mxu0 %vm475_vm0, %v474_v1  ;;  %v434_v3 = vld [vmem:[%s622_s3] sm:$0xff]   ;;  %v435_v4 = vld [vmem:[%s622_s3 + $0x8] sm:$0xff]   ;;  %v437_v7 = vld [vmem:[%s622_s3 + $0x18] sm:$0xff]  }
   0x3   :  { %383 = vmatprep.subr.bf16.mxu0 %v474_v1  ;;  %405 = vmatprep.mubr.msk.bf16.mxu1 %vm475_vm0, %v474_v1  ;;  %v28_v5 = vld [vmem:[%s619_s0] sm:$0x1] }
   0x4   :  { %390 = vmatpush3.bf16.msra.mxu1 %v434_v3 }
   0x5   :  { %391 = vmatprep.subr.bf16.mxu1 %v474_v1 }
   0x6   :  { %384 = vmatpush3.bf16.msra.mxu0 %v433_v2 }
   0x7   :  { %409 = vmatprep.subr.bf16.mxu0 %v474_v1 }
   0x8   :  { %392 = vmatpush3.bf16.msra.mxu1 %v435_v4 }
   0x9   :  { %386 = vmatmul.mubr.msk.bf16.vlgmr.msra.gmra.mrb[0].mxu0 %vm52_vm1, %v28_v5  ;;  %393 = vmatprep.subr.bf16.mxu1 %v474_v1 }
   0xa   :  { %425 = vmatprep.mubr.msk.bf16.mxu0 %vm475_vm0, %v474_v1 }
   0xc   :  { %394 = vmatpush3.bf16.msra.mxu1 %v436_v6 }
   0xd   :  { %395 = vmatprep.subr.bf16.mxu1 %v474_v1 }
   0xe   :  { %12 = vsyncpa [#allocation3], 0  ;;  %v438_v8 = vld [vmem:[%s622_s3 + $0x20] sm:$0xff]   ;;  %v439_v9 = vld [vmem:[%s622_s3 + $0x28] sm:$0xff]   ;;  %s476_s16 = smov [#allocation2]   ;;  %vm322_vm2 = vcmask 25600  }
   0xf   :  { %v440_v10 = vld [vmem:[%s622_s3 + $0x30] sm:$0xff]   ;;  %v441_v11 = vld [vmem:[%s622_s3 + $0x38] sm:$0xff]   ;;  %v442_v12 = vld [vmem:[%s624_s5] sm:$0xff]   ;;  %s330_s17 = sshll.u32 %s476_s16, 4  ;;  %s331_s17 = int_to_ptr.vmem [resolvable:$true] %s330_s17 }
  0x10   :  { %396 = vmatpush3.bf16.msra.mxu1 %v437_v7  ;;  %410 = vmatpush3.bf16.msra.mxu0 %v442_v12  ;;  %v443_v13 = vld [vmem:[%s624_s5 + $0x8] sm:$0xff]   ;;  %v444_v14 = vld [vmem:[%s624_s5 + $0x10] sm:$0xff]   ;;  %v445_v15 = vld [vmem:[%s624_s5 + $0x18] sm:$0xff]   ;;  %p455_p1 = scmp.lt.s32.totalorder %s331_s17, %s331_s17 }
  0x11   :  { %397 = vmatprep.subr.bf16.mxu1 %v474_v1  ;;  %411 = vmatprep.subr.bf16.mxu0 %v474_v1  ;;  %v446_v16 = vld [vmem:[%s624_s5 + $0x20] sm:$0xff]   ;;  %v447_v17 = vld [vmem:[%s624_s5 + $0x28] sm:$0xff]   ;;  %v448_v26 = vld [vmem:[%s624_s5 + $0x30] sm:$0xff]  }
  0x12   :  { %v338_v18 = vld [vmem:[%s621_s2] ss:$0 sm:$0xff]  ;;  %v449_v27 = vld [vmem:[%s624_s5 + $0x38] sm:$0xff]  }
  0x13   :  { %v342_v28 = vld [vmem:[%s623_s4] ss:$0 sm:$0xff]  ;;  %s450_s4 = scalar_lea.vmem %s331_s17, 32 }
  0x14   :  { %398 = vmatpush3.bf16.msra.mxu1 %v438_v8  ;;  %412 = vmatpush3.bf16.msra.mxu0 %v443_v13  ;;  %v351_v36 = vld [vmem:[%s625_s6] ss:$0 sm:$0xff]  ;;  %p451_p0 = scmp.ne.s32.totalorder %s331_s17, %s450_s4  ;;  %p456_p2 = scmp.lt.s32.totalorder %s450_s4, %s450_s4 }
  0x15   :  { %399 = vmatprep.subr.bf16.mxu1 %v474_v1  ;;  %413 = vmatprep.subr.bf16.mxu0 %v474_v1 }
  0x16   :  { %p457_p3 = por %p456_p2, %p455_p1 }
  0x18   :  { %400 = vmatpush3.bf16.msra.mxu1 %v439_v9  ;;  %414 = vmatpush3.bf16.msra.mxu0 %v444_v14  ;;  %p458_p4 = pnand %p457_p3, %p451_p0 }
  0x19   :  { %401 = vmatprep.subr.bf16.mxu1 %v474_v1  ;;  %415 = vmatprep.subr.bf16.mxu0 %v474_v1 }
  0x1c   :  { %402 = vmatpush3.bf16.msra.mxu1 %v440_v10  ;;  %416 = vmatpush3.bf16.msra.mxu0 %v445_v15 }
  0x1d   :  { %403 = vmatprep.subr.bf16.mxu1 %v474_v1  ;;  %417 = vmatprep.subr.bf16.mxu0 %v474_v1 }
  0x20   :  { %404 = vmatpush3.bf16.msra.mxu1 %v441_v11  ;;  %418 = vmatpush3.bf16.msra.mxu0 %v446_v16 }
  0x21   :  { %419 = vmatprep.subr.bf16.mxu0 %v474_v1 }
  0x24   :  { %420 = vmatpush3.bf16.msra.mxu0 %v447_v17 }
  0x25   :  { %421 = vmatprep.subr.bf16.mxu0 %v474_v1 }
  0x28   :  { %422 = vmatpush3.bf16.msra.mxu0 %v448_v26 }
  0x29   :  { %423 = vmatprep.subr.bf16.mxu0 %v474_v1 }
  0x2c   :  { %424 = vmatpush3.bf16.msra.mxu0 %v449_v27 }
  0xdc   :  { %v90_v19 = vpop.f32.mrb[0].mxu0 }
  0xdd   :  { %v91_v20 = vadd.f32 %v338_v18, %v90_v19  ;;  %v387_v21 = vpop.f32.mrb[1].mxu0 }
  0xde   :  { %v93_v22 = vpop.f32.mrb[2].mxu0 }
  0xdf   :  { %v96_v23 = vmax.f32 %v91_v20, 0.0  ;;  %v388_v24 = vpop.f32.mrb[3].mxu0 }
  0xe1   :  { %v97_v25 = vpack.c.bf16 %v96_v23, %v96_v23 }
  0xe3   :  { %406 = vmatmul.mubr.bf16.vlgmr.msra.gmra.mrb[0].mxu1 %v97_v25 }
 0x1b6   :  { %v203_v29 = vpop.f32.mrb[0].mxu1 }
 0x1b7   :  { %v204_v30 = vadd.f32 %v342_v28, %v203_v29  ;;  %v407_v31 = vpop.f32.mrb[1].mxu1 }
 0x1b8   :  { %v206_v32 = vpop.f32.mrb[2].mxu1 }
 0x1b9   :  { %v209_v33 = vmax.f32 %v204_v30, 0.0  ;;  %v408_v34 = vpop.f32.mrb[3].mxu1 }
 0x1bb   :  { %v210_v35 = vpack.c.bf16 %v209_v33, %v209_v33 }
 0x1bd   :  { %426 = vmatmul.mubr.bf16.vlgmr.msra.gmra.mrb[4].mxu0 %v210_v35 }
 0x290   :  { %v316_v37 = vpop.f32.mrb[4].mxu0 }
 0x291   :  { %v317_v38 = vadd.f32 %v351_v36, %v316_v37  ;;  %v427_v39 = vpop.f32.mrb[5].mxu0 }
 0x292   :  { %v319_v40 = vpop.f32.mrb[6].mxu0 }
 0x293   :  { %v428_v41 = vpop.f32.mrb[7].mxu0  ;;  %323 = vst.msk [vmem:[#allocation2] sm:$0x3] %vm322_vm2, %v317_v38 }
 0x294   :  { %461 = shalt.err (!%p458_p4)
}
 0x295   :  { %s462_s6 = scalar_lea.hbm %s626_s7, 32 }
 0x296   :  { %p463_p5 = scmp.ne.s32.totalorder %s626_s7, %s462_s6  ;;  %p466_p6 = scmp.lt.u32.totalorder %s462_s6, %s626_s7 }
 0x298   :  { %p468_p7 = pnand %p466_p6, %p463_p5 }
 0x29a   :  { %471 = shalt.err (!%p468_p7)
}
 0x29b   :  { %333 = dma.vmem_to_hbm [thread:$0]  %s331_s17, 32, %s626_s7, [#allocation3]  }
 0x29c   :  { %472 = dma.done.wait [#allocation3], 32  }
 0x29d   :  { %473 = vsyncadd [#allocation3], 4294967264 }
 0x29e   :  { %337 = vsyncpa [#allocation3], 1 }

</bundles_post_ra>
